<compile_context>
chip_gen: v6e
topology: v6e:2x2x1
jax: 0.10.0
libtpu: 0.0.40
codegen_flags: <defaults>
</compile_context>

<pallas_src>
import functools

import jax
import jax.numpy as jnp
from jax.experimental import pallas as pl
from jax.experimental.pallas import tpu as pltpu


# ----------------------------------------------------------------------------
# helpers
# ----------------------------------------------------------------------------
def _round_up(x, m):
    return (x + m - 1) // m * m


def _tile_rows(n, max_tile=1024, align=16):
    """Pick a row tile (multiple of 16 for bf16-safe sublane tiling) and padded row count.

    Tries to keep the grid >= 2 steps so both TensorCores (v7x megacore) get work."""
    tm = min(max_tile, _round_up(n, align))
    n_pad = _round_up(n, tm)
    if n_pad // tm < 2 and n > align:
        tm = max(align, _round_up(pl.cdiv(n, 2), align))
        n_pad = _round_up(n, tm)
    return tm, n_pad


def _gelu(x):
    # matches torch.nn.functional.gelu default ('none' == erf formulation)
    return 0.5 * x * (1.0 + jax.lax.erf(x * 0.7071067811865476))


# ----------------------------------------------------------------------------
# Pallas kernels
# ----------------------------------------------------------------------------
def _linear_kernel(x_ref, w_ref, b_ref, o_ref, *, apply_gelu):
    y = jnp.dot(x_ref[...].astype(jnp.float32), w_ref[...],
                preferred_element_type=jnp.float32)
    y = y + b_ref[...]
    if apply_gelu:
        y = _gelu(y)
    o_ref[...] = y.astype(o_ref.dtype)


def linear_pallas(x, w, b, apply_gelu=False, out_dtype=jnp.float32, tm=None):
    """y = x @ w + b (optionally GELU-fused), tiled over rows. Rows must be padded to tm."""
    m, k = x.shape
    k2, n = w.shape
    assert k == k2
    if tm is None:
        tm, m_pad = _tile_rows(m)
        assert m_pad == m, "caller must pre-pad rows"
    assert m % tm == 0
    return pl.pallas_call(
        functools.partial(_linear_kernel, apply_gelu=apply_gelu),
        out_shape=jax.ShapeDtypeStruct((m, n), out_dtype),
        grid_spec=pltpu.PrefetchScalarGridSpec(
            num_scalar_prefetch=0,
            grid=(m // tm,),
            in_specs=[
                pl.BlockSpec((tm, k), lambda i: (i, 0)),
                pl.BlockSpec((k, n), lambda i: (0, 0)),
                pl.BlockSpec((1, n), lambda i: (0, 0)),
            ],
            out_specs=pl.BlockSpec((tm, n), lambda i: (i, 0)),
        ),
        compiler_params=pltpu.CompilerParams(
            dimension_semantics=("parallel",),
            vmem_limit_bytes=32 * 1024 * 1024,
        ),
    )(x, w, b)


def _gnn_layer_kernel(*refs, n_mid, k_neighbors, eps):
    """Fused GNN layer: neighbor combine + GELU -> [mid MLP] -> mean_K -> last affine
    -> LayerNorm -> p1 + GELU -> p2.  All weights resident in VMEM."""
    s_nb_ref, og_ref, wx_ref = refs[0], refs[1], refs[2]
    mid_refs = refs[3:3 + 2 * n_mid]
    (wl_ref, bl_ref, lng_ref, lnb_ref,
     wp1_ref, bp1_ref, wp2_ref, bp2_ref, o_ref) = refs[3 + 2 * n_mid:]

    s = s_nb_ref[...].astype(jnp.float32)            # (K, tm, H0) gathered source transform
    og = og_ref[...].astype(jnp.float32)             # (tm, d)   target coords
    wx = wx_ref[...]                                 # (d, H0)

    # t_i = x_i @ Wx, done on the VPU (d is tiny -> avoid a degenerate MXU contraction)
    d = og.shape[1]
    t = og[:, 0:1] * wx[0:1, :]
    for j in range(1, d):
        t = t + og[:, j:j + 1] * wx[j:j + 1, :]

    h = _gelu(s + t[None, :, :])                     # (K, tm, H0) == GELU(agg @ W0 + b0)

    # optional middle kernel-MLP layers (GELU) on the K-expanded activations
    for li in range(n_mid):
        w = mid_refs[2 * li][...]
        b = mid_refs[2 * li + 1][...]
        kk, tm_, hh = h.shape
        h2 = jnp.dot(h.reshape(kk * tm_, hh), w, preferred_element_type=jnp.float32) + b
        h = _gelu(h2).reshape(kk, tm_, -1)

    # mean over neighbors BEFORE the final affine layer (algebraically identical, K x cheaper)
    m = jnp.sum(h, axis=0) * (1.0 / k_neighbors)     # (tm, Hmid)
    u = jnp.dot(m, wl_ref[...], preferred_element_type=jnp.float32) + bl_ref[...]

    # LayerNorm
    mu = jnp.mean(u, axis=-1, keepdims=True)
    var = jnp.mean(jnp.square(u - mu), axis=-1, keepdims=True)
    y = (u - mu) * jax.lax.rsqrt(var + eps)
    y = y * lng_ref[...] + lnb_ref[...]

    # projection MLP: Linear + GELU + Linear
    v = _gelu(jnp.dot(y, wp1_ref[...], preferred_element_type=jnp.float32) + bp1_ref[...])
    o = jnp.dot(v, wp2_ref[...], preferred_element_type=jnp.float32) + bp2_ref[...]
    o_ref[...] = o.astype(o_ref.dtype)


def gnn_layer_fused(p, x, in_grid_pad, out_grid_pad, nbr_t, tm):
    """One GnnLayer forward.  x: (n_pad, C) f32.  nbr_t: (K, n_pad) int32."""
    n_pad, c = x.shape
    d = in_grid_pad.shape[-1]
    k = nbr_t.shape[0]

    kmlp = p["kernel_mlp"]
    assert len(kmlp) >= 2
    w0, b0 = kmlp[0]
    wy, wx, wf = w0[:d], w0[d:2 * d], w0[2 * d:]

    # source transform on N rows (replaces the first K*N-row matmul), stored bf16 for the gather
    src_in = jnp.concatenate([in_grid_pad, x], axis=-1)          # (n_pad, d + C)
    w_src = jnp.concatenate([wy, wf], axis=0)                    # (d + C, H0)
    s = linear_pallas(src_in, w_src, b0, out_dtype=jnp.bfloat16, tm=tm)

    # neighbor gather directly in (K, N, H0) layout — no transpose of the expanded tensor
    # TODO(synk): data-dependent row gather stays in XLA; an in-Pallas scalar-prefetch DMA
    #             gather would remove this last HBM-materialized K-expanded tensor.
    s_nb = jnp.take(s, nbr_t, axis=0)                            # (K, n_pad, H0) bf16

    mids = kmlp[1:-1]
    w_last, b_last = kmlp[-1]
    wp1, bp1 = p["p1"]
    wp2, bp2 = p["p2"]
    h0 = s.shape[-1]

    operands = [s_nb, out_grid_pad, wx]
    in_specs = [
        pl.BlockSpec((k, tm, h0), lambda i: (0, i, 0)),
        pl.BlockSpec((tm, d), lambda i: (i, 0)),
        pl.BlockSpec((d, h0), lambda i: (0, 0)),
    ]
    for (wm, bm) in mids:
        operands += [wm, bm]
        in_specs += [pl.BlockSpec(wm.shape, lambda i: (0, 0)),
                     pl.BlockSpec(bm.shape, lambda i: (0, 0))]
    tail = [w_last, b_last, p["ln_g"], p["ln_b"], wp1, bp1, wp2, bp2]
    operands += tail
    in_specs += [pl.BlockSpec(a.shape, lambda i: (0, 0)) for a in tail]

    kernel = functools.partial(_gnn_layer_kernel, n_mid=len(mids),
                               k_neighbors=k, eps=1e-5)
    return pl.pallas_call(
        kernel,
        out_shape=jax.ShapeDtypeStruct((n_pad, c), jnp.float32),
        grid_spec=pltpu.PrefetchScalarGridSpec(
            num_scalar_prefetch=0,
            grid=(n_pad // tm,),
            in_specs=in_specs,
            out_specs=pl.BlockSpec((tm, c), lambda i: (i, 0)),
        ),
        compiler_params=pltpu.CompilerParams(
            dimension_semantics=("parallel",),
            vmem_limit_bytes=32 * 1024 * 1024,
        ),
    )(*operands)


# ----------------------------------------------------------------------------
# Parameter init (deterministic, PyTorch nn.Linear-style uniform)
# ----------------------------------------------------------------------------
def init_linear(key, fan_in, fan_out):
    kw, kb = jax.random.split(key)
    bound = 1.0 / (fan_in ** 0.5)
    w = jax.random.uniform(kw, (fan_in, fan_out), jnp.float32, -bound, bound)
    b = jax.random.uniform(kb, (1, fan_out), jnp.float32, -bound, bound)
    return w, b


def init_gnn_params(key, in_dim, out_dim, hidden_dim, lifting_dim, n_dim,
                    gno_mlp_layers, n_layers):
    keys = jax.random.split(key, 2 + n_layers)
    params = {
        "lift": init_linear(keys[0], in_dim, hidden_dim),      # MLPLinear([in, hidden])
        "proj": init_linear(keys[1], hidden_dim, out_dim),     # MLPLinear([hidden, out])
        "layers": [],
    }
    kernel_dims = [2 * n_dim + hidden_dim] + list(gno_mlp_layers) + [hidden_dim]
    for li in range(n_layers):
        lk = jax.random.split(keys[2 + li], len(kernel_dims) + 2)
        kmlp = [init_linear(lk[j], kernel_dims[j], kernel_dims[j + 1])
                for j in range(len(kernel_dims) - 1)]
        params["layers"].append({
            "kernel_mlp": kmlp,
            "ln_g": jnp.ones((1, hidden_dim), jnp.float32),
            "ln_b": jnp.zeros((1, hidden_dim), jnp.float32),
            "p1": init_linear(lk[-2], hidden_dim, lifting_dim),
            "p2": init_linear(lk[-1], lifting_dim, hidden_dim),
        })
    return params


# ----------------------------------------------------------------------------
# Forward pass
# ----------------------------------------------------------------------------
def knn_indices(in_grid, out_grid, k):
    # plain-JAX glue: static grids -> static neighbor table
    d2 = jnp.sum((out_grid[:, None, :] - in_grid[None, :, :]) ** 2, axis=-1)
    _, idx = jax.lax.top_k(-d2, k)
    return idx  # (n_out, k)


def gnn_forward(params, inp, in_grid, out_grid, nbr_idx):
    # inp: (1, n_points, in_dim)  -- only batch_size = 1, as in the PyTorch module
    x0 = inp[0]
    n = x0.shape[0]
    tm, n_pad = _tile_rows(n)
    pad = n_pad - n

    x0 = jnp.pad(x0, ((0, pad), (0, 0)))
    in_g = jnp.pad(in_grid, ((0, pad), (0, 0)))
    out_g = jnp.pad(out_grid, ((0, pad), (0, 0)))
    nbr_t = jnp.pad(nbr_idx, ((0, pad), (0, 0))).T.astype(jnp.int32)   # (K, n_pad)

    x = linear_pallas(x0, *params["lift"], tm=tm)                      # lifting
    for p in params["layers"]:
        x = gnn_layer_fused(p, x, in_g, out_g, nbr_t, tm)
    x = linear_pallas(x, *params["proj"], tm=tm)                       # projection
    return x[None, :n, :]                                              # (1, n_points, out_dim)


# ----------------------------------------------------------------------------
if __name__ == "__main__":
    n_points, n_dim = 256, 2
    in_dim, hidden_dim, out_dim = 4, 32, 3
    lifting_dim = 32
    n_neighbor = 8
    n_layers = 2
    gno_mlp_layers = [32]

    key = jax.random.PRNGKey(0)
    k_inp, k_grid, k_par = jax.random.split(key, 3)

    inp = jax.random.normal(k_inp, (1, n_points, in_dim), jnp.float32)
    initial_mesh = jax.random.uniform(k_grid, (n_points, n_dim), jnp.float32)

    params = init_gnn_params(k_par, in_dim, out_dim, hidden_dim, lifting_dim,
                             n_dim, gno_mlp_layers, n_layers)
    nbr_idx = knn_indices(initial_mesh, initial_mesh, n_neighbor)

    out = gnn_forward(params, inp, initial_mesh, initial_mesh, nbr_idx)
    out = jax.block_until_ready(out)
    assert out.shape == (1, n_points, out_dim), out.shape
    assert bool(jnp.all(jnp.isfinite(out)))
    print("KERNEL_OK")
</pallas_src>

<mosaic_0001>
module attributes {stable_mosaic.version = 11 : i64} {
  func.func @_linear_kernel(%arg0: i32, %arg1: memref<128x4xf32, #tpu.memory_space<vmem>>, %arg2: memref<4x32xf32, #tpu.memory_space<vmem>>, %arg3: memref<1x32xf32, #tpu.memory_space<vmem>>, %arg4: memref<128x32xf32, #tpu.memory_space<vmem>>) attributes {dimension_semantics = [#tpu.dimension_semantics<parallel>], iteration_bounds = array<i64: 2>, scalar_prefetch = 0 : i64, scratch_operands = 0 : i64, tpu.core_type = #tpu.core_type<tc>, window_params = [{transform_indices = @transform_0, window_bounds = array<i64: 128, 4>}, {pipeline_mode = #tpu.pipeline_mode<synchronous>, transform_indices = @transform_1, window_bounds = array<i64: 4, 32>}, {pipeline_mode = #tpu.pipeline_mode<synchronous>, transform_indices = @transform_2, window_bounds = array<i64: 1, 32>}, {transform_indices = @transform_3, window_bounds = array<i64: 128, 32>}]} {
    %c0 = arith.constant 0 : index
    %c0_0 = arith.constant 0 : index
    %0 = vector.load %arg1[%c0, %c0_0] : memref<128x4xf32, #tpu.memory_space<vmem>>, vector<128x4xf32>
    %c0_1 = arith.constant 0 : index
    %c0_2 = arith.constant 0 : index
    %1 = vector.load %arg2[%c0_1, %c0_2] : memref<4x32xf32, #tpu.memory_space<vmem>>, vector<4x32xf32>
    %cst = arith.constant dense<0.000000e+00> : vector<128x32xf32>
    %2 = tpu.matmul %0, %1, %cst {dimension_numbers = #tpu.dot_dimension_numbers<[1], [0], [0], [1], [0, 0, 1, 1], [], []>} : vector<128x4xf32>, vector<4x32xf32>, vector<128x32xf32> -> vector<128x32xf32>
    %c0_3 = arith.constant 0 : index
    %c0_4 = arith.constant 0 : index
    %3 = vector.load %arg3[%c0_3, %c0_4] : memref<1x32xf32, #tpu.memory_space<vmem>>, vector<1x32xf32>
    %4 = vector.broadcast %3 : vector<1x32xf32> to vector<128x32xf32>
    %5 = arith.addf %2, %4 : vector<128x32xf32>
    %c0_5 = arith.constant 0 : index
    %c0_6 = arith.constant 0 : index
    %6 = vector.load %arg4[%c0_5, %c0_6] : memref<128x32xf32, #tpu.memory_space<vmem>>, vector<128x32xf32>
    tpu.vector_store %arg4[%c0_5, %c0_6], %5 {strides = array<i32>} : memref<128x32xf32, #tpu.memory_space<vmem>>, vector<128x32xf32>,
    return
  }
  func.func @transform_0(%arg0: i32) -> (i32, i32) {
    %c0_i32 = arith.constant 0 : i32
    %c0_i32_0 = arith.constant 0 : i32
    return %arg0, %c0_i32 : i32, i32
  }
  func.func @transform_1(%arg0: i32) -> (i32, i32) {
    %c0_i32 = arith.constant 0 : i32
    %c0_i32_0 = arith.constant 0 : i32
    %c0_i32_1 = arith.constant 0 : i32
    return %c0_i32, %c0_i32_0 : i32, i32
  }
  func.func @transform_2(%arg0: i32) -> (i32, i32) {
    %c0_i32 = arith.constant 0 : i32
    %c0_i32_0 = arith.constant 0 : i32
    %c0_i32_1 = arith.constant 0 : i32
    return %c0_i32, %c0_i32_0 : i32, i32
  }
  func.func @transform_3(%arg0: i32) -> (i32, i32) {
    %c0_i32 = arith.constant 0 : i32
    %c0_i32_0 = arith.constant 0 : i32
    return %arg0, %c0_i32 : i32, i32
  }
}

</mosaic_0001>

<bundles_post_ra>
// kernel: tpu_custom_call.1
= control target key start
LH: loop header
LB: loop body
LE: loop exit
PB: predicated region body
PF: predicated region fallthrough
CT: control target
= control target key end

     0   :  { %s579_s12 = smov 0   ;;  %s659_s0 = inlined_call_operand.vmem [shape: f32[256,4], index: 0, kind: input, shape index: {}]   ;;  %s660_s1 = inlined_call_operand.vmem [shape: f32[4,32], index: 1, kind: input, shape index: {}]   ;;  %s661_s2 = inlined_call_operand.vmem [shape: f32[1,32], index: 2, kind: input, shape index: {}]   ;;  %s662_s3 = inlined_call_operand.vmem [shape: f32[256,32], index: 3, kind: output, shape index: {}]  }
   0x1 LB: > { %s469_s13 = sadd.s32 4294967295, %s557_s12   ;;  %p473_p0 = scmp.ge.s32.totalorder %s557_s12, 1  ;;  %s557_s12 = sphi %s579_s12, %s13_s12  }
   0x2   : > { %p138_p1 = scmp.lt.s32.totalorder %s557_s12, 3 }
   0x4   : > { %p139_p2 = pnand %p473_p0, %p138_p1 }
   0x5   : > { %s474_s16 = sshll.u32 (!%p139_p2), %s469_s13, 4 }
   0x6   : > { %142 = sbr.rel (%p139_p2) target bundleno = 227 (0xe3), region = 32  ;;  %p163_p3 = scmp.lt.s32.totalorder (!%p139_p2), %s474_s16, 31 }
   0xb   : > { %v190_v0 = vld [vmem:[%s660_s1] sm:$0xf]  ;;  %vm247_vm0 = vcmask 1043456   ;;  %s664_s16 = smov (!%p163_p3, %s474_s16), 31  ;;  %vm198_vm1 = vcmask 31744   ;;  %vm396_vm2 = vcmask 261120  }
   0xc   : > { %515 = vmatprep.subr.msk.mxu0 %vm247_vm0, %v190_v0  ;;  %541 = vmatprep.subr.msk.mxu1 %vm247_vm0, %v190_v0  ;;  %s475_s17 = sshll.u32 %s664_s16, 3  ;;  %v478_v17 = vld [vmem:[%s661_s2] ss:$0 sm:$0xff] }
   0xd   : > { %516 = vmatpush3.msk.msra.mxu0 %vm247_vm0, %v190_v0  ;;  %542 = vmatpush3.msk.msra.mxu1 %vm247_vm0, %v190_v0  ;;  %s166_s20 = scalar_lea.vmem %s659_s0, %s475_s17  ;;  %s622_s25 = scalar_lea.vmem %s662_s3, %s475_s17 }
   0xe   : > { %v174_v1 = vld [vmem:[%s166_s20] sm:$0xff]  ;;  %v175_v3 = vld [vmem:[%s166_s20 + $0x8] sm:$0xff]  ;;  %v176_v5 = vld [vmem:[%s166_s20 + $0x10] sm:$0xff] }
   0xf   : > { %v182_v2 = vld [vmem:[%s166_s20 + $0x40] sm:$0xff]  ;;  %517 = vmatprep.mubr.msk.f32.mxu0 %vm198_vm1, %v174_v1  ;;  %v183_v4 = vld [vmem:[%s166_s20 + $0x48] sm:$0xff]  ;;  %v184_v6 = vld [vmem:[%s166_s20 + $0x50] sm:$0xff] }
  0x10   : > { %529 = vmatprep.mubr.msk.f32.mxu1 %vm198_vm1, %v182_v2  ;;  %518 = vmatmul.mubr.msk.f32.vlgmr.msra.gmra.mxu0 %vm198_vm1, %v175_v3  ;;  %v177_v7 = vld [vmem:[%s166_s20 + $0x18] sm:$0xff]  ;;  %v178_v9 = vld [vmem:[%s166_s20 + $0x20] sm:$0xff]  ;;  %v179_v11 = vld [vmem:[%s166_s20 + $0x28] sm:$0xff] }
  0x11   : > { %530 = vmatmul.mubr.msk.f32.vlgmr.msra.gmra.mxu1 %vm198_vm1, %v183_v4  ;;  %520 = vmatprep.mubr.msk.f32.mxu0 %vm198_vm1, %v176_v5  ;;  %v185_v8 = vld [vmem:[%s166_s20 + $0x58] sm:$0xff]  ;;  %v186_v10 = vld [vmem:[%s166_s20 + $0x60] sm:$0xff]  ;;  %v187_v12 = vld [vmem:[%s166_s20 + $0x68] sm:$0xff] }
  0x12   : > { %532 = vmatprep.mubr.msk.f32.mxu1 %vm198_vm1, %v184_v6  ;;  %v180_v13 = vld [vmem:[%s166_s20 + $0x30] sm:$0xff]  ;;  %v181_v15 = vld [vmem:[%s166_s20 + $0x38] sm:$0xff] }
  0x13   : > { %v188_v14 = vld [vmem:[%s166_s20 + $0x70] sm:$0xff]  ;;  %v189_v16 = vld [vmem:[%s166_s20 + $0x78] sm:$0xff] }
  0x14   : > { %521 = vmatmul.mubr.msk.f32.gmra.mxu0 %vm198_vm1, %v177_v7 }
  0x15   : > { %533 = vmatmul.mubr.msk.f32.gmra.mxu1 %vm198_vm1, %v185_v8  ;;  %523 = vmatprep.mubr.msk.f32.mxu0 %vm198_vm1, %v178_v9 }
  0x16   : > { %535 = vmatprep.mubr.msk.f32.mxu1 %vm198_vm1, %v186_v10 }
  0x18   : > { %524 = vmatmul.mubr.msk.f32.gmra.mxu0 %vm198_vm1, %v179_v11 }
  0x19   : > { %536 = vmatmul.mubr.msk.f32.gmra.mxu1 %vm198_vm1, %v187_v12  ;;  %526 = vmatprep.mubr.msk.f32.mxu0 %vm198_vm1, %v180_v13 }
  0x1a   : > { %538 = vmatprep.mubr.msk.f32.mxu1 %vm198_vm1, %v188_v14 }
  0x1c   : > { %527 = vmatmul.mubr.msk.f32.gmra.mxu0 %vm198_vm1, %v181_v15 }
  0x1d   : > { %539 = vmatmul.mubr.msk.f32.gmra.mxu1 %vm198_vm1, %v189_v16 }
  0xd0   : > { %v519_v18 = vpop.f32.mrf.mxu0 }
  0xd1   : > { %v531_v19 = vpop.f32.mrf.mxu1  ;;  %v323_v20 = vadd.f32 %v519_v18, %v478_v17 }
  0xd2   : > { %v363_v21 = vadd.f32 %v531_v19, %v478_v17  ;;  %v317_v22 = vpop.f32.mrf.mxu0 }
  0xd3   : > { %v357_v23 = vpop.f32.mrf.mxu1  ;;  %398 = vst.msk [vmem:[%s622_s25 + $0x8] sm:$0xff] %vm396_vm2, %v323_v20  ;;  %v318_v24 = vadd.f32 %v478_v17, %v317_v22 }
  0xd4   : > { %406 = vst.msk [vmem:[%s622_s25 + $0x48] sm:$0xff] %vm396_vm2, %v363_v21  ;;  %v358_v25 = vadd.f32 %v478_v17, %v357_v23  ;;  %v522_v26 = vpop.f32.mrf.mxu0 }
  0xd5   : > { %v534_v27 = vpop.f32.mrf.mxu1  ;;  %397 = vst.msk [vmem:[%s622_s25] sm:$0xff] %vm396_vm2, %v318_v24  ;;  %v333_v28 = vadd.f32 %v522_v26, %v478_v17 }
  0xd6   : > { %405 = vst.msk [vmem:[%s622_s25 + $0x40] sm:$0xff] %vm396_vm2, %v358_v25  ;;  %v373_v29 = vadd.f32 %v534_v27, %v478_v17  ;;  %v327_v30 = vpop.f32.mrf.mxu0 }
  0xd7   : > { %v367_v31 = vpop.f32.mrf.mxu1  ;;  %400 = vst.msk [vmem:[%s622_s25 + $0x18] sm:$0xff] %vm396_vm2, %v333_v28  ;;  %v328_v32 = vadd.f32 %v478_v17, %v327_v30 }
  0xd8   : > { %408 = vst.msk [vmem:[%s622_s25 + $0x58] sm:$0xff] %vm396_vm2, %v373_v29  ;;  %v368_v33 = vadd.f32 %v478_v17, %v367_v31  ;;  %v525_v34 = vpop.f32.mrf.mxu0 }
  0xd9   : > { %v537_v35 = vpop.f32.mrf.mxu1  ;;  %399 = vst.msk [vmem:[%s622_s25 + $0x10] sm:$0xff] %vm396_vm2, %v328_v32  ;;  %v343_v36 = vadd.f32 %v525_v34, %v478_v17 }
  0xda   : > { %407 = vst.msk [vmem:[%s622_s25 + $0x50] sm:$0xff] %vm396_vm2, %v368_v33  ;;  %v383_v37 = vadd.f32 %v537_v35, %v478_v17  ;;  %v337_v38 = vpop.f32.mrf.mxu0 }
  0xdb   : > { %v377_v39 = vpop.f32.mrf.mxu1  ;;  %402 = vst.msk [vmem:[%s622_s25 + $0x28] sm:$0xff] %vm396_vm2, %v343_v36  ;;  %v338_v40 = vadd.f32 %v478_v17, %v337_v38 }
  0xdc   : > { %410 = vst.msk [vmem:[%s622_s25 + $0x68] sm:$0xff] %vm396_vm2, %v383_v37  ;;  %v378_v41 = vadd.f32 %v478_v17, %v377_v39  ;;  %v528_v42 = vpop.f32.mrf.mxu0 }
  0xdd   : > { %v540_v43 = vpop.f32.mrf.mxu1  ;;  %401 = vst.msk [vmem:[%s622_s25 + $0x20] sm:$0xff] %vm396_vm2, %v338_v40  ;;  %v353_v44 = vadd.f32 %v528_v42, %v478_v17 }
  0xde   : > { %409 = vst.msk [vmem:[%s622_s25 + $0x60] sm:$0xff] %vm396_vm2, %v378_v41  ;;  %v393_v45 = vadd.f32 %v540_v43, %v478_v17  ;;  %v347_v46 = vpop.f32.mrf.mxu0 }
  0xdf   : > { %v387_v47 = vpop.f32.mrf.mxu1  ;;  %404 = vst.msk [vmem:[%s622_s25 + $0x38] sm:$0xff] %vm396_vm2, %v353_v44  ;;  %v348_v48 = vadd.f32 %v478_v17, %v347_v46 }
  0xe0   : > { %412 = vst.msk [vmem:[%s622_s25 + $0x78] sm:$0xff] %vm396_vm2, %v393_v45  ;;  %v388_v49 = vadd.f32 %v478_v17, %v387_v47 }
  0xe1   : > { %403 = vst.msk [vmem:[%s622_s25 + $0x30] sm:$0xff] %vm396_vm2, %v348_v48 }
  0xe2   : > { %411 = vst.msk [vmem:[%s622_s25 + $0x70] sm:$0xff] %vm396_vm2, %v388_v49 }
  0xe3 PF: > { %s13_s12 = sadd.s32 1, %s557_s12  }
  0xe4   : > { %p10_p4 = scmp.ge.s32.totalorder %s13_s12, 4  }
  0xe6   :  { %12 = sbr.rel (!%p10_p4) target bundleno = 1 (0x1), region = 62 }

</bundles_post_ra>
